<compile_context>
chip_gen: v6e
topology: v6e:2x2x1
jax: 0.10.0
libtpu: 0.0.40
codegen_flags: <defaults>
</compile_context>

<pallas_src>
import math

import jax
import jax.numpy as jnp
from jax import lax
from jax.experimental import pallas as pl
from jax.experimental.pallas import tpu as pltpu


def _make_fused_mha_kernel(n_heads, d_k, d_v, inv_scale, matmul_dtype):
    def kernel(x_ref, wq_ref, wk_ref, wv_ref, out_ref):
        # x_ref: (N, D)  wq/wk_ref: (D, H*d_k)  wv_ref: (D, H*d_v)
        # out_ref: (N, H*d_v)  — all resident in VMEM (single invocation).
        x = x_ref[...]

        def mm(a, b):
            # MXU matmul: (optionally reduced-precision) operands, f32 accumulate.
            return jnp.dot(a.astype(matmul_dtype), b.astype(matmul_dtype),
                           preferred_element_type=jnp.float32)

        # Fused projections: one wide matmul each instead of H tiny per-head ones.
        q = mm(x, wq_ref[...])            # (N, H*d_k) f32
        k = mm(x, wk_ref[...])            # (N, H*d_k) f32
        v = mm(x, wv_ref[...])            # (N, H*d_v) f32

        # Fold the softmax scale into Q once.
        q = q * inv_scale

        # Per-head attention; H is small & static -> unrolled at trace time.
        for h in range(n_heads):
            qh = q[:, h * d_k:(h + 1) * d_k]   # (N, d_k)
            kh = k[:, h * d_k:(h + 1) * d_k]   # (N, d_k)
            vh = v[:, h * d_v:(h + 1) * d_v]   # (N, d_v)

            # Q @ K^T without materializing K^T: contract the last dims directly.
            s = lax.dot_general(
                qh.astype(matmul_dtype), kh.astype(matmul_dtype),
                dimension_numbers=(((1,), (1,)), ((), ())),
                preferred_element_type=jnp.float32)            # (N, N) f32

            # Max-subtracted softmax, kept in f32 (numerics + v5e has no bf16 VPU/EUP).
            m = jnp.max(s, axis=-1, keepdims=True)
            p = jnp.exp(s - m)
            denom = jnp.sum(p, axis=-1, keepdims=True)          # (N, 1)

            # attn @ V first, then normalize the (N, d_v) result:
            # O(N*d_v) multiplies instead of O(N^2), reciprocal rides the EUP.
            ctx = mm(p, vh)                                     # (N, d_v) f32
            ctx = ctx * pl.reciprocal(denom, approx=True)

            # Write this head's d_v lane range of the lane-dense output block.
            out_ref[:, h * d_v:(h + 1) * d_v] = ctx.astype(out_ref.dtype)

    return kernel


def multi_head_attention(x, wq, wk, wv, n_heads, *, matmul_dtype=jnp.float32):
    """Pallas implementation of MultiHeadAttention.forward.

    x  : (N, D)          float32
    wq : (D, H * d_k)    float32   (W_Q.weight.T — original torch layout, untransposed here)
    wk : (D, H * d_k)
    wv : (D, H * d_v)
    matmul_dtype : operand dtype fed to the MXU (f32 exact; bf16 = v6e/v7x fast path).
    returns: (N, H * d_v) — exact permuted layout of the torch reference.
    """
    N, D = x.shape
    H = n_heads
    d_k = D // H
    d_v = d_k
    inv_scale = 1.0 / math.sqrt(d_k)

    kernel = _make_fused_mha_kernel(H, d_k, d_v, inv_scale, matmul_dtype)

    vmem = pltpu.MemorySpace.VMEM
    ctx_concat = pl.pallas_call(
        kernel,
        out_shape=jax.ShapeDtypeStruct((N, H * d_v), jnp.float32),
        in_specs=[
            pl.BlockSpec(memory_space=vmem),   # X
            pl.BlockSpec(memory_space=vmem),   # W_Q  (whole, original layout)
            pl.BlockSpec(memory_space=vmem),   # W_K
            pl.BlockSpec(memory_space=vmem),   # W_V
        ],
        out_specs=pl.BlockSpec(memory_space=vmem),
    )(x, wq, wk, wv)

    # ctx_concat[n, h*d_v + d] == context[h, n, d] (natural head-concat layout).
    # Reproduce torch's `context.transpose(1, 2).reshape(-1, H*d_v)` permuted
    # output with cheap JAX layout ops (pure shuffle, no compute).
    out = ctx_concat.reshape(N, H, d_v).transpose(1, 2, 0).reshape(N, H * d_v)
    return out


def _reference(x, wq, wk, wv, n_heads):
    """Pure-JAX re-statement of the torch forward (for correctness check)."""
    N, D = x.shape
    H = n_heads
    d_k = D // H
    q = (x @ wq).reshape(N, H, d_k).transpose(1, 0, 2)
    k = (x @ wk).reshape(N, H, d_k).transpose(1, 0, 2)
    v = (x @ wv).reshape(N, H, d_k).transpose(1, 0, 2)
    scores = jnp.einsum("hnd,hmd->hnm", q, k) / math.sqrt(d_k)
    attn = jax.nn.softmax(scores, axis=-1)
    ctx = jnp.einsum("hnm,hmd->hnd", attn, v)
    return jnp.transpose(ctx, (0, 2, 1)).reshape(N, H * d_k)


if __name__ == "__main__":
    # Shapes implied by the module's forward: X is (N, input_dim) = (8, 32),
    # n_heads = 4 -> d_k = d_v = 8.
    input_dim = 32
    n_heads = 4
    N = 8

    key = jax.random.PRNGKey(0)
    kx, kq, kk, kv = jax.random.split(key, 4)

    x = jax.random.normal(kx, (N, input_dim), dtype=jnp.float32)
    # torch Linear(in, out, bias=False).weight is (out, in); we store W.T = (in, out).
    wq = jax.random.normal(kq, (input_dim, n_heads * (input_dim // n_heads)),
                           dtype=jnp.float32) * 0.1
    wk = jax.random.normal(kk, (input_dim, n_heads * (input_dim // n_heads)),
                           dtype=jnp.float32) * 0.1
    wv = jax.random.normal(kv, (input_dim, n_heads * (input_dim // n_heads)),
                           dtype=jnp.float32) * 0.1
    # NOTE: self.fc is defined in __init__ but never used in forward -> not applied.

    ref = _reference(x, wq, wk, wv, n_heads)

    # f32 operands: faithful to the fp32 torch module (approx-reciprocal only
    # adds ~1e-4 relative error on the normalization).
    out_f32 = jax.block_until_ready(multi_head_attention(x, wq, wk, wv, n_heads))
    assert out_f32.shape == (N, input_dim)
    assert jnp.allclose(out_f32, ref, atol=1e-3, rtol=1e-3), "f32 kernel mismatch vs reference"

    # bf16 MXU operands / f32 accumulation: the v6e/v7x peak-throughput path.
    out_bf16 = jax.block_until_ready(
        multi_head_attention(x, wq, wk, wv, n_heads, matmul_dtype=jnp.bfloat16))
    assert out_bf16.shape == (N, input_dim)
    assert jnp.allclose(out_bf16, ref, atol=3e-2, rtol=3e-2), "bf16 kernel mismatch vs reference"

    print("KERNEL_OK")
</pallas_src>

<mosaic_0001>
module attributes {stable_mosaic.version = 11 : i64} {
  func.func @kernel(%arg0: memref<8x32xf32, #tpu.memory_space<vmem>>, %arg1: memref<32x32xf32, #tpu.memory_space<vmem>>, %arg2: memref<32x32xf32, #tpu.memory_space<vmem>>, %arg3: memref<32x32xf32, #tpu.memory_space<vmem>>, %arg4: memref<8x32xf32, #tpu.memory_space<vmem>>) attributes {dimension_semantics = [], scalar_prefetch = 0 : i64, scratch_operands = 0 : i64, tpu.core_type = #tpu.core_type<tc>} {
    %c0 = arith.constant 0 : index
    %c0_0 = arith.constant 0 : index
    %0 = vector.load %arg0[%c0, %c0_0] : memref<8x32xf32, #tpu.memory_space<vmem>>, vector<8x32xf32>
    %c0_1 = arith.constant 0 : index
    %c0_2 = arith.constant 0 : index
    %1 = vector.load %arg1[%c0_1, %c0_2] : memref<32x32xf32, #tpu.memory_space<vmem>>, vector<32x32xf32>
    %cst = arith.constant dense<0.000000e+00> : vector<8x32xf32>
    %2 = tpu.matmul %0, %1, %cst {dimension_numbers = #tpu.dot_dimension_numbers<[1], [0], [0], [1], [0, 0, 1, 1], [], []>} : vector<8x32xf32>, vector<32x32xf32>, vector<8x32xf32> -> vector<8x32xf32>
    %c0_3 = arith.constant 0 : index
    %c0_4 = arith.constant 0 : index
    %3 = vector.load %arg2[%c0_3, %c0_4] : memref<32x32xf32, #tpu.memory_space<vmem>>, vector<32x32xf32>
    %cst_5 = arith.constant dense<0.000000e+00> : vector<8x32xf32>
    %4 = tpu.matmul %0, %3, %cst_5 {dimension_numbers = #tpu.dot_dimension_numbers<[1], [0], [0], [1], [0, 0, 1, 1], [], []>} : vector<8x32xf32>, vector<32x32xf32>, vector<8x32xf32> -> vector<8x32xf32>
    %c0_6 = arith.constant 0 : index
    %c0_7 = arith.constant 0 : index
    %5 = vector.load %arg3[%c0_6, %c0_7] : memref<32x32xf32, #tpu.memory_space<vmem>>, vector<32x32xf32>
    %cst_8 = arith.constant dense<0.000000e+00> : vector<8x32xf32>
    %6 = tpu.matmul %0, %5, %cst_8 {dimension_numbers = #tpu.dot_dimension_numbers<[1], [0], [0], [1], [0, 0, 1, 1], [], []>} : vector<8x32xf32>, vector<32x32xf32>, vector<8x32xf32> -> vector<8x32xf32>
    %cst_9 = arith.constant 0.353553385 : f32
    %7 = vector.broadcast %cst_9 : f32 to vector<8x32xf32>
    %8 = arith.mulf %2, %7 : vector<8x32xf32>
    %9 = vector.extract_strided_slice %8 {offsets = [0, 0], sizes = [8, 8], strides = [1, 1]} : vector<8x32xf32> to vector<8x8xf32>
    %10 = vector.extract_strided_slice %4 {offsets = [0, 0], sizes = [8, 8], strides = [1, 1]} : vector<8x32xf32> to vector<8x8xf32>
    %11 = vector.extract_strided_slice %6 {offsets = [0, 0], sizes = [8, 8], strides = [1, 1]} : vector<8x32xf32> to vector<8x8xf32>
    %cst_10 = arith.constant dense<0.000000e+00> : vector<8x8xf32>
    %12 = tpu.matmul %9, %10, %cst_10 {dimension_numbers = #tpu.dot_dimension_numbers<[1], [1], [0], [0], [0, 0, 1, 0], [], []>} : vector<8x8xf32>, vector<8x8xf32>, vector<8x8xf32> -> vector<8x8xf32>
    %cst_11 = arith.constant dense<0xFF800000> : vector<8xf32>
    %13 = vector.multi_reduction <maximumf>, %12, %cst_11 [1] : vector<8x8xf32> to vector<8xf32>
    %14 = vector.shape_cast %13 : vector<8xf32> to vector<8x1xf32>
    %15 = vector.broadcast %14 : vector<8x1xf32> to vector<8x8xf32>
    %16 = arith.subf %12, %15 : vector<8x8xf32>
    %17 = math.exp %16 : vector<8x8xf32>
    %cst_12 = arith.constant dense<0.000000e+00> : vector<8xf32>
    %18 = vector.multi_reduction <add>, %17, %cst_12 [1] : vector<8x8xf32> to vector<8xf32>
    %19 = vector.shape_cast %18 : vector<8xf32> to vector<8x1xf32>
    %cst_13 = arith.constant dense<0.000000e+00> : vector<8x8xf32>
    %20 = tpu.matmul %17, %11, %cst_13 {dimension_numbers = #tpu.dot_dimension_numbers<[1], [0], [0], [1], [0, 0, 1, 1], [], []>} : vector<8x8xf32>, vector<8x8xf32>, vector<8x8xf32> -> vector<8x8xf32>
    %21 = tpu.reciprocal %19 {approx = true} : vector<8x1xf32> -> vector<8x1xf32>
    %22 = vector.broadcast %21 : vector<8x1xf32> to vector<8x8xf32>
    %23 = arith.mulf %20, %22 : vector<8x8xf32>
    %c0_14 = arith.constant 0 : index
    %c0_15 = arith.constant 0 : index
    %24 = vector.load %arg4[%c0_14, %c0_15] : memref<8x32xf32, #tpu.memory_space<vmem>>, vector<8x8xf32>
    tpu.vector_store %arg4[%c0_14, %c0_15], %23 {strides = array<i32>} : memref<8x32xf32, #tpu.memory_space<vmem>>, vector<8x8xf32>,
    %25 = vector.extract_strided_slice %8 {offsets = [0, 8], sizes = [8, 8], strides = [1, 1]} : vector<8x32xf32> to vector<8x8xf32>
    %26 = vector.extract_strided_slice %4 {offsets = [0, 8], sizes = [8, 8], strides = [1, 1]} : vector<8x32xf32> to vector<8x8xf32>
    %27 = vector.extract_strided_slice %6 {offsets = [0, 8], sizes = [8, 8], strides = [1, 1]} : vector<8x32xf32> to vector<8x8xf32>
    %cst_16 = arith.constant dense<0.000000e+00> : vector<8x8xf32>
    %28 = tpu.matmul %25, %26, %cst_16 {dimension_numbers = #tpu.dot_dimension_numbers<[1], [1], [0], [0], [0, 0, 1, 0], [], []>} : vector<8x8xf32>, vector<8x8xf32>, vector<8x8xf32> -> vector<8x8xf32>
    %cst_17 = arith.constant dense<0xFF800000> : vector<8xf32>
    %29 = vector.multi_reduction <maximumf>, %28, %cst_17 [1] : vector<8x8xf32> to vector<8xf32>
    %30 = vector.shape_cast %29 : vector<8xf32> to vector<8x1xf32>
    %31 = vector.broadcast %30 : vector<8x1xf32> to vector<8x8xf32>
    %32 = arith.subf %28, %31 : vector<8x8xf32>
    %33 = math.exp %32 : vector<8x8xf32>
    %cst_18 = arith.constant dense<0.000000e+00> : vector<8xf32>
    %34 = vector.multi_reduction <add>, %33, %cst_18 [1] : vector<8x8xf32> to vector<8xf32>
    %35 = vector.shape_cast %34 : vector<8xf32> to vector<8x1xf32>
    %cst_19 = arith.constant dense<0.000000e+00> : vector<8x8xf32>
    %36 = tpu.matmul %33, %27, %cst_19 {dimension_numbers = #tpu.dot_dimension_numbers<[1], [0], [0], [1], [0, 0, 1, 1], [], []>} : vector<8x8xf32>, vector<8x8xf32>, vector<8x8xf32> -> vector<8x8xf32>
    %37 = tpu.reciprocal %35 {approx = true} : vector<8x1xf32> -> vector<8x1xf32>
    %38 = vector.broadcast %37 : vector<8x1xf32> to vector<8x8xf32>
    %39 = arith.mulf %36, %38 : vector<8x8xf32>
    %c0_20 = arith.constant 0 : index
    %c8 = arith.constant 8 : index
    %40 = vector.load %arg4[%c0_20, %c8] : memref<8x32xf32, #tpu.memory_space<vmem>>, vector<8x8xf32>
    tpu.vector_store %arg4[%c0_20, %c8], %39 {strides = array<i32>} : memref<8x32xf32, #tpu.memory_space<vmem>>, vector<8x8xf32>,
    %41 = vector.extract_strided_slice %8 {offsets = [0, 16], sizes = [8, 8], strides = [1, 1]} : vector<8x32xf32> to vector<8x8xf32>
    %42 = vector.extract_strided_slice %4 {offsets = [0, 16], sizes = [8, 8], strides = [1, 1]} : vector<8x32xf32> to vector<8x8xf32>
    %43 = vector.extract_strided_slice %6 {offsets = [0, 16], sizes = [8, 8], strides = [1, 1]} : vector<8x32xf32> to vector<8x8xf32>
    %cst_21 = arith.constant dense<0.000000e+00> : vector<8x8xf32>
    %44 = tpu.matmul %41, %42, %cst_21 {dimension_numbers = #tpu.dot_dimension_numbers<[1], [1], [0], [0], [0, 0, 1, 0], [], []>} : vector<8x8xf32>, vector<8x8xf32>, vector<8x8xf32> -> vector<8x8xf32>
    %cst_22 = arith.constant dense<0xFF800000> : vector<8xf32>
    %45 = vector.multi_reduction <maximumf>, %44, %cst_22 [1] : vector<8x8xf32> to vector<8xf32>
    %46 = vector.shape_cast %45 : vector<8xf32> to vector<8x1xf32>
    %47 = vector.broadcast %46 : vector<8x1xf32> to vector<8x8xf32>
    %48 = arith.subf %44, %47 : vector<8x8xf32>
    %49 = math.exp %48 : vector<8x8xf32>
    %cst_23 = arith.constant dense<0.000000e+00> : vector<8xf32>
    %50 = vector.multi_reduction <add>, %49, %cst_23 [1] : vector<8x8xf32> to vector<8xf32>
    %51 = vector.shape_cast %50 : vector<8xf32> to vector<8x1xf32>
    %cst_24 = arith.constant dense<0.000000e+00> : vector<8x8xf32>
    %52 = tpu.matmul %49, %43, %cst_24 {dimension_numbers = #tpu.dot_dimension_numbers<[1], [0], [0], [1], [0, 0, 1, 1], [], []>} : vector<8x8xf32>, vector<8x8xf32>, vector<8x8xf32> -> vector<8x8xf32>
    %53 = tpu.reciprocal %51 {approx = true} : vector<8x1xf32> -> vector<8x1xf32>
    %54 = vector.broadcast %53 : vector<8x1xf32> to vector<8x8xf32>
    %55 = arith.mulf %52, %54 : vector<8x8xf32>
    %c0_25 = arith.constant 0 : index
    %c16 = arith.constant 16 : index
    %56 = vector.load %arg4[%c0_25, %c16] : memref<8x32xf32, #tpu.memory_space<vmem>>, vector<8x8xf32>
    tpu.vector_store %arg4[%c0_25, %c16], %55 {strides = array<i32>} : memref<8x32xf32, #tpu.memory_space<vmem>>, vector<8x8xf32>,
    %57 = vector.extract_strided_slice %8 {offsets = [0, 24], sizes = [8, 8], strides = [1, 1]} : vector<8x32xf32> to vector<8x8xf32>
    %58 = vector.extract_strided_slice %4 {offsets = [0, 24], sizes = [8, 8], strides = [1, 1]} : vector<8x32xf32> to vector<8x8xf32>
    %59 = vector.extract_strided_slice %6 {offsets = [0, 24], sizes = [8, 8], strides = [1, 1]} : vector<8x32xf32> to vector<8x8xf32>
    %cst_26 = arith.constant dense<0.000000e+00> : vector<8x8xf32>
    %60 = tpu.matmul %57, %58, %cst_26 {dimension_numbers = #tpu.dot_dimension_numbers<[1], [1], [0], [0], [0, 0, 1, 0], [], []>} : vector<8x8xf32>, vector<8x8xf32>, vector<8x8xf32> -> vector<8x8xf32>
    %cst_27 = arith.constant dense<0xFF800000> : vector<8xf32>
    %61 = vector.multi_reduction <maximumf>, %60, %cst_27 [1] : vector<8x8xf32> to vector<8xf32>
    %62 = vector.shape_cast %61 : vector<8xf32> to vector<8x1xf32>
    %63 = vector.broadcast %62 : vector<8x1xf32> to vector<8x8xf32>
    %64 = arith.subf %60, %63 : vector<8x8xf32>
    %65 = math.exp %64 : vector<8x8xf32>
    %cst_28 = arith.constant dense<0.000000e+00> : vector<8xf32>
    %66 = vector.multi_reduction <add>, %65, %cst_28 [1] : vector<8x8xf32> to vector<8xf32>
    %67 = vector.shape_cast %66 : vector<8xf32> to vector<8x1xf32>
    %cst_29 = arith.constant dense<0.000000e+00> : vector<8x8xf32>
    %68 = tpu.matmul %65, %59, %cst_29 {dimension_numbers = #tpu.dot_dimension_numbers<[1], [0], [0], [1], [0, 0, 1, 1], [], []>} : vector<8x8xf32>, vector<8x8xf32>, vector<8x8xf32> -> vector<8x8xf32>
    %69 = tpu.reciprocal %67 {approx = true} : vector<8x1xf32> -> vector<8x1xf32>
    %70 = vector.broadcast %69 : vector<8x1xf32> to vector<8x8xf32>
    %71 = arith.mulf %68, %70 : vector<8x8xf32>
    %c0_30 = arith.constant 0 : index
    %c24 = arith.constant 24 : index
    %72 = vector.load %arg4[%c0_30, %c24] : memref<8x32xf32, #tpu.memory_space<vmem>>, vector<8x8xf32>
    tpu.vector_store %arg4[%c0_30, %c24], %71 {strides = array<i32>} : memref<8x32xf32, #tpu.memory_space<vmem>>, vector<8x8xf32>,
    return
  }
}

</mosaic_0001>

<bundles_post_ra>
// kernel: tpu_custom_call.1
= control target key start
LH: loop header
LB: loop body
LE: loop exit
PB: predicated region body
PF: predicated region fallthrough
CT: control target
= control target key end

     0   :  { %9 = vsyncpa [#allocation3], 0  ;;  %s1388_s0 = inlined_call_operand.hbm [shape: f32[8,32], index: 0, kind: input, shape index: {}]   ;;  %s1389_s1 = inlined_call_operand.hbm [shape: f32[32,32], index: 1, kind: input, shape index: {}]   ;;  %s1390_s2 = inlined_call_operand.hbm [shape: f32[32,32], index: 2, kind: input, shape index: {}]   ;;  %s1391_s3 = inlined_call_operand.hbm [shape: f32[32,32], index: 3, kind: input, shape index: {}]   ;;  %s1392_s4 = inlined_call_operand.hbm [shape: f32[8,32], index: 4, kind: output, shape index: {}]  }
   0x1   :  { %10 = vsyncpa [#allocation6], 0 }
   0x2   :  { %11 = vsyncpa [#allocation9], 0 }
   0x3   :  { %12 = vsyncpa [#allocation4], 0  ;;  %s1249_s15 = smov [#allocation5]  }
   0x4   :  { %s28_s16 = sshll.u32 %s1249_s15, 4  ;;  %s29_s16 = int_to_ptr.vmem [resolvable:$true] %s28_s16 }
   0x5   :  { %s1149_s17 = scalar_lea.vmem %s29_s16, 512  ;;  %p1154_p1 = scmp.lt.s32.totalorder %s29_s16, %s29_s16 }
   0x6   :  { %p1150_p0 = scmp.ne.s32.totalorder %s29_s16, %s1149_s17  ;;  %p1155_p2 = scmp.lt.s32.totalorder %s1149_s17, %s1149_s17 }
   0x8   :  { %p1156_p3 = por %p1155_p2, %p1154_p1 }
   0xa   :  { %p1157_p4 = pnand %p1156_p3, %p1150_p0 }
   0xc   :  { %1160 = shalt.err (!%p1157_p4)
}
   0xd   :  { %s1250_s18 = smov 128   ;;  %s1251_s19 = smov 8  }
   0xe   :  { %34 = dma.hbm_to_vmem [thread:$0]  %s1389_s1, 512, %s29_s16, [#allocation6], %s1250_s18, %s1250_s18, %s1251_s19  }
   0xf   :  { %s1252_s22 = smov [#allocation2]   ;;  %s1253_s24 = smov [#allocation7]  }
  0x10   :  { %s19_s23 = sshll.u32 %s1252_s22, 4  ;;  %s40_s25 = sshll.u32 %s1253_s24, 4  ;;  %s20_s23 = int_to_ptr.vmem [resolvable:$true] %s19_s23  ;;  %s41_s25 = int_to_ptr.vmem [resolvable:$true] %s40_s25 }
  0x11   :  { %s1169_s26 = scalar_lea.vmem %s20_s23, 128  ;;  %p1174_p6 = scmp.lt.s32.totalorder %s20_s23, %s20_s23 }
  0x12   :  { %p1170_p5 = scmp.ne.s32.totalorder %s20_s23, %s1169_s26  ;;  %p1175_p7 = scmp.lt.s32.totalorder %s1169_s26, %s1169_s26 }
  0x14   :  { %p1176_p8 = por %p1175_p7, %p1174_p6 }
  0x16   :  { %p1177_p9 = pnand %p1176_p8, %p1170_p5 }
  0x18   :  { %1180 = shalt.err (!%p1177_p9)
}
  0x19   :  { %22 = dma.hbm_to_vmem [thread:$0]  %s1388_s0, 128, %s20_s23, [#allocation3]  }
  0x1a   :  { %s1189_s29 = scalar_lea.vmem %s41_s25, 512  ;;  %p1194_p11 = scmp.lt.s32.totalorder %s41_s25, %s41_s25 }
  0x1b   :  { %p1190_p10 = scmp.ne.s32.totalorder %s41_s25, %s1189_s29  ;;  %p1195_p12 = scmp.lt.s32.totalorder %s1189_s29, %s1189_s29 }
  0x1d   :  { %p1196_p13 = por %p1195_p12, %p1194_p11 }
  0x1f   :  { %p1197_p0 = pnand %p1196_p13, %p1190_p10 }
  0x21   :  { %1200 = shalt.err (!%p1197_p0)
}
  0x22   :  { %46 = dma.hbm_to_vmem [thread:$0]  %s1390_s2, 512, %s41_s25, [#allocation6], %s1250_s18, %s1250_s18, %s1251_s19  }
  0x23   :  { %s1254_s5 = smov [#allocation8]  }
  0x24   :  { %s52_s6 = sshll.u32 %s1254_s5, 4  ;;  %s53_s6 = int_to_ptr.vmem [resolvable:$true] %s52_s6 }
  0x25   :  { %s1209_s7 = scalar_lea.vmem %s53_s6, 512  ;;  %p1214_p2 = scmp.lt.s32.totalorder %s53_s6, %s53_s6 }
  0x26   :  { %p1210_p1 = scmp.ne.s32.totalorder %s53_s6, %s1209_s7  ;;  %p1215_p3 = scmp.lt.s32.totalorder %s1209_s7, %s1209_s7 }
  0x28   :  { %p1216_p4 = por %p1215_p3, %p1214_p2 }
  0x2a   :  { %p1217_p5 = pnand %p1216_p4, %p1210_p1 }
  0x2c   :  { %1220 = shalt.err (!%p1217_p5)
}
  0x2d   :  { %58 = dma.hbm_to_vmem [thread:$0]  %s1391_s3, 512, %s53_s6, [#allocation9], %s1250_s18, %s1250_s18, %s1251_s19  }
  0x2e   :  { %1241 = dma.done.wait [#allocation3], 128  }
  0x2f   :  { %1242 = vsyncadd [#allocation3], 4294967168 }
  0x30   :  { %1243 = dma.done.wait [#allocation6], 1024  }
  0x31   :  { %1244 = vsyncadd [#allocation6], 4294966272 }
  0x32   :  { %1245 = dma.done.wait [#allocation9], 512  }
  0x33   :  { %1246 = vsyncadd [#allocation9], 4294966784  ;;  %v1255_v0 = vmov 0.0   ;;  %vm1256_vm0 = vmmov 0   ;;  %v75_v1 = vld [vmem:[#allocation5 + $0x18] sm:$0xff]  ;;  %v74_v3 = vld [vmem:[#allocation5 + $0x10] sm:$0xff] }
  0x34   :  { %1038 = vmatprep.subr.mxu0 %v1255_v0  ;;  %1049 = vmatprep.subr.mxu1 %v1255_v0  ;;  %v153_v2 = vld [vmem:[#allocation7 + $0x18] sm:$0xff]  ;;  %v152_v4 = vld [vmem:[#allocation7 + $0x10] sm:$0xff]  ;;  %v73_v5 = vld [vmem:[#allocation5 + $0x8] sm:$0xff]  ;;  %vm76_vm1 = vcmask 261120   ;;  %vm299_vm2 = vcmask 64512   ;;  %s1257_s2 = smov 112  }
  0x35   :  { %1046 = vmatprep.mubr.msk.f32.mxu0 %vm1256_vm0, %v1255_v0  ;;  %1057 = vmatprep.mubr.msk.f32.mxu1 %vm1256_vm0, %v1255_v0  ;;  %v151_v6 = vld [vmem:[#allocation7 + $0x8] sm:$0xff]  ;;  %v72_v7 = vld [vmem:[#allocation5] sm:$0xff]  ;;  %v71_v9 = vld [vmem:[#allocation2] sm:$0xff]  ;;  %s1258_s3 = smov 120   ;;  %s1259_s9 = smov 104   ;;  %vm631_vm3 = vcmask 130112  }
  0x36   :  { %1039 = vmatpush3.msra.mxu0 %v75_v1  ;;  %1050 = vmatpush3.msra.mxu1 %v153_v2  ;;  %v150_v8 = vld [vmem:[#allocation7] sm:$0xff]  ;;  %v227_v10 = vld [vmem:[#allocation8 + $0x18] sm:$0xff]  ;;  %v226_v11 = vld [vmem:[#allocation8 + $0x10] sm:$0xff]  ;;  %s1260_s10 = smov 16   ;;  %s1261_s11 = smov 24   ;;  %vm802_vm4 = vcmask 195712  }
  0x37   :  { %1040 = vmatprep.subr.mxu0 %v1255_v0  ;;  %1051 = vmatprep.subr.mxu1 %v1255_v0  ;;  %v225_v12 = vld [vmem:[#allocation8 + $0x8] sm:$0xff]  ;;  %v224_v13 = vld [vmem:[#allocation8] sm:$0xff]  ;;  %s1262_s12 = smov [#allocation10]   ;;  %vm973_vm5 = vcmask 261312  }
  0x38   :  { %1041 = vmatpush3.msra.mxu0 %v74_v3  ;;  %1052 = vmatpush3.msra.mxu1 %v152_v4  ;;  %s981_s13 = sshll.u32 %s1262_s12, 4  ;;  %s982_s13 = int_to_ptr.vmem [resolvable:$true] %s981_s13 }
  0x39   :  { %1042 = vmatprep.subr.mxu0 %v1255_v0  ;;  %1053 = vmatprep.subr.mxu1 %v1255_v0  ;;  %s1221_s14 = scalar_lea.vmem %s982_s13, 128  ;;  %p1226_p7 = scmp.lt.s32.totalorder %s982_s13, %s982_s13 }
  0x3a   :  { %1043 = vmatpush3.msra.mxu0 %v73_v5  ;;  %1054 = vmatpush3.msra.mxu1 %v151_v6  ;;  %p1222_p6 = scmp.ne.s32.totalorder %s982_s13, %s1221_s14  ;;  %p1227_p8 = scmp.lt.s32.totalorder %s1221_s14, %s1221_s14 }
  0x3b   :  { %1044 = vmatprep.subr.mxu0 %v1255_v0  ;;  %1055 = vmatprep.subr.mxu1 %v1255_v0 }
  0x3c   :  { %1045 = vmatpush3.msra.mxu0 %v72_v7  ;;  %1056 = vmatpush3.msra.mxu1 %v150_v8  ;;  %p1228_p9 = por %p1227_p8, %p1226_p7 }
  0x3d   :  { %1047 = vmatmul.mubr.msk.f32.vlgmr.msra.gmra.mxu0 %vm76_vm1, %v71_v9  ;;  %1058 = vmatmul.mubr.msk.f32.vlgmr.msra.gmra.mxu1 %vm76_vm1, %v71_v9 }
  0x3e   :  { %1071 = vmatprep.subr.mxu1 %v1255_v0  ;;  %1073 = vmatprep.mubr.msk.f32.mxu1 %vm1256_vm0, %v1255_v0  ;;  %p1229_p10 = pnand %p1228_p9, %p1222_p6 }
  0x3f   :  { %1060 = vmatprep.subr.mxu0 %v1255_v0  ;;  %1068 = vmatprep.mubr.msk.f32.mxu0 %vm1256_vm0, %v1255_v0 }
  0x40   :  { %1061 = vmatpush3.msra.mxu0 %v227_v10 }
  0x41   :  { %1062 = vmatprep.subr.mxu0 %v1255_v0 }
  0x42   :  { %1063 = vmatpush3.msra.mxu0 %v226_v11 }
  0x43   :  { %1064 = vmatprep.subr.mxu0 %v1255_v0 }
  0x44   :  { %1065 = vmatpush3.msra.mxu0 %v225_v12 }
  0x45   :  { %1066 = vmatprep.subr.mxu0 %v1255_v0 }
  0x46   :  { %1067 = vmatpush3.msra.mxu0 %v224_v13 }
  0x47   :  { %1069 = vmatmul.mubr.msk.f32.vlgmr.msra.gmra.mxu0 %vm76_vm1, %v71_v9  ;;  %1081 = vmatprep.subr.mxu0 %v1255_v0 }
  0x48   :  { %1083 = vmatprep.mubr.msk.f32.mxu0 %vm1256_vm0, %v1255_v0 }
  0xfd   :  { %v146_v14 = vpop.f32.mrf.mxu0  ;;  %v220_v15 = vpop.f32.mrf.mxu1 }
  0xfe   :  { %v298_v16 = vmul.f32 0.35355338, %v146_v14  ;;  %635 = vrot.lane.b32.xlu1 %v220_v15, %s1257_s2  ;;  %463 = vrot.lane.b32.xlu0 %v220_v15, %s1258_s3 }
  0xff   :  { %1072 = vmatpush3.xpose.msk.msra.mxu1 %vm299_vm2, %v220_v15  ;;  %v1048_v17 = vpop.f32.mrf.mxu0  ;;  %v1059_v18 = vpop.f32.mrf.mxu1 }
 0x100   :  { %1076 = vmatprep.subr.mxu1 %v1255_v0 }
 0x102   :  { %1074 = vmatmul.mubr.msk.f32.vlgmr.msra.gmra.mxu1 %vm299_vm2, %v298_v16  ;;  %633 = vrot.lane.b32.xlu1 %v298_v16, %s1257_s2 }
 0x103   :  { %461 = vrot.lane.b32.xlu0 %v298_v16, %s1258_s3  ;;  %1078 = vmatprep.mubr.msk.f32.mxu1 %vm1256_vm0, %v1255_v0 }
 0x106   :  { %804 = vrot.lane.b32.xlu1 %v298_v16, %s1259_s9 }
 0x107   :  { %806 = vrot.lane.b32.xlu0 %v220_v15, %s1259_s9  ;;  %v294_v19 = vpop.f32.mrf.mxu0 }
 0x108   :  { %1077 = vmatpush3.msra.mxu1 %v294_v19 }
 0x109   :  { %v1070_v20 = vpop.f32.mrf.mxu0  ;;  %1086 = vmatprep.subr.mxu1 %v1255_v0 }
 0x170   :  { %v464_v21 = vpop.permute.xlu0 %463  ;;  %v636_v22 = vpop.permute.xlu1 %635 }
 0x171   :  { %1082 = vmatpush3.xpose.msk.msra.mxu0 %vm299_vm2, %v464_v21 }
 0x172   :  { %1091 = vmatprep.subr.mxu0 %v1255_v0 }
 0x174   :  { %v634_v24 = vpop.permute.xlu1 %633 }
 0x175   :  { %v462_v23 = vpop.permute.xlu0 %461 }
 0x176   :  { %1084 = vmatmul.mubr.msk.f32.vlgmr.msra.gmra.mxu0 %vm299_vm2, %v462_v23 }
 0x177   :  { %1092 = vmatpush3.xpose.msk.msra.mxu0 %vm299_vm2, %v636_v22  ;;  %1093 = vmatprep.mubr.msk.f32.mxu0 %vm1256_vm0, %v1255_v0 }
 0x178   :  { %1101 = vmatprep.subr.mxu0 %v1255_v0  ;;  %v805_v26 = vpop.permute.xlu1 %804 }
 0x179   :  { %v807_v25 = vpop.permute.xlu0 %806 }
 0x17a   :  { %1094 = vmatmul.mubr.msk.f32.vlgmr.msra.gmra.mxu0 %vm299_vm2, %v634_v24 }
 0x17b   :  { %1102 = vmatpush3.xpose.msk.msra.mxu0 %vm299_vm2, %v807_v25  ;;  %1103 = vmatprep.mubr.msk.f32.mxu0 %vm1256_vm0, %v1255_v0 }
 0x17e   :  { %1104 = vmatmul.mubr.msk.f32.vlgmr.msra.gmra.mxu0 %vm299_vm2, %v805_v26 }
 0x1c2   :  { %v372_v27 = vpop.f32.mrf.mxu1 }
 0x1c3   :  { %v376_v28 = vsel %vm299_vm2, %v372_v27, -inf }
 0x1c4   :  { %377 = vmax.xlane.f32.xlu0 %v376_v28  ;;  %v1075_v29 = vpop.f32.mrf.mxu1 }
 0x236   :  { %v535_v30 = vpop.f32.mrf.mxu0 }
 0x237   :  { %v539_v31 = vsel %vm299_vm2, %v535_v30, -inf }
 0x238   :  { %540 = vmax.xlane.f32.xlu1 %v539_v31  ;;  %v1085_v32 = vpop.f32.mrf.mxu0 }
 0x23a   :  { %v707_v33 = vpop.f32.mrf.mxu0 }
 0x23b   :  { %v711_v34 = vsel %vm299_vm2, %v707_v33, -inf }
 0x23c   :  { %712 = vmax.xlane.f32.xlu0 %v711_v34  ;;  %v1095_v35 = vpop.f32.mrf.mxu0 }
 0x23e   :  { %v878_v36 = vpop.f32.mrf.mxu0 }
 0x23f   :  { %v882_v37 = vsel %vm299_vm2, %v878_v36, -inf }
 0x240   :  { %883 = vmax.xlane.f32.xlu0 %v882_v37  ;;  %v1105_v38 = vpop.f32.mrf.mxu0 }
 0x249   :  { %549 = vrot.lane.b32.xlu1 %v294_v19, %s1258_s3 }
 0x24d   :  { %v378_v39 = vpop.xlane.xlu0 %377  ;;  %891 = vrot.lane.b32.xlu1 %v294_v19, %s1259_s9 }
 0x24e   :  { %v379_v40 = vsub.f32 %v372_v27, %v378_v39 }
 0x250   :  { %v380_v41 = vmul.f32 1.442695, %v379_v40 }
 0x252   :  { %1125 = vpow2.f32 %v380_v41 }
 0x256   :  { %720 = vrot.lane.b32.xlu0 %v294_v19, %s1257_s2 }
 0x25f   :  { %v1126_v42 = vpop.eup %1125 }
 0x260   :  { %1079 = vmatmul.mubr.msk.f32.vlgmr.msra.gmra.mxu1 %vm299_vm2, %v1126_v42  ;;  %v382_v58 = vsel %vm299_vm2, %v1126_v42, 0.0 }
 0x261   :  { %1088 = vmatprep.mubr.msk.f32.mxu1 %vm1256_vm0, %v1255_v0 }
 0x2c1   :  { %v541_v43 = vpop.xlane.xlu1 %540 }
 0x2c2   :  { %v542_v44 = vsub.f32 %v535_v30, %v541_v43 }
 0x2c4   :  { %v543_v45 = vmul.f32 1.442695, %v542_v44 }
 0x2c5   :  { %v550_v46 = vpop.permute.xlu1 %549  ;;  %v713_v47 = vpop.xlane.xlu0 %712 }
 0x2c6   :  { %1127 = vpow2.f32 %v543_v45  ;;  %v714_v48 = vsub.f32 %v707_v33, %v713_v47  ;;  %1087 = vmatpush3.msra.mxu1 %v550_v46 }
 0x2c7   :  { %1096 = vmatprep.subr.mxu1 %v1255_v0 }
 0x2c8   :  { %v715_v49 = vmul.f32 1.442695, %v714_v48 }
 0x2c9   :  { %v884_v50 = vpop.xlane.xlu0 %883  ;;  %v892_v57 = vpop.permute.xlu1 %891 }
 0x2ca   :  { %1129 = vpow2.f32 %v715_v49  ;;  %v885_v51 = vsub.f32 %v878_v36, %v884_v50 }
 0x2cc   :  { %v886_v52 = vmul.f32 1.442695, %v885_v51 }
 0x2cd   :  { %v721_v54 = vpop.permute.xlu0 %720 }
 0x2ce   :  { %1131 = vpow2.f32 %v886_v52 }
 0x2d3   :  { %v1128_v53 = vpop.eup %1127 }
 0x2d4   :  { %1089 = vmatmul.mubr.msk.f32.vlgmr.msra.gmra.mxu1 %vm299_vm2, %v1128_v53  ;;  %v545_v55 = vsel %vm299_vm2, %v1128_v53, 0.0 }
 0x2d5   :  { %1097 = vmatpush3.msra.mxu1 %v721_v54  ;;  %546 = vadd.xlane.f32.xlu1 %v545_v55 }
 0x2d6   :  { %1098 = vmatprep.mubr.msk.f32.mxu1 %vm1256_vm0, %v1255_v0  ;;  %1106 = vmatprep.subr.mxu1 %v1255_v0 }
 0x2d7   :  { %v1130_v56 = vpop.eup %1129 }
 0x2d8   :  { %1099 = vmatmul.mubr.msk.f32.vlgmr.msra.gmra.mxu1 %vm299_vm2, %v1130_v56  ;;  %v717_v59 = vsel %vm299_vm2, %v1130_v56, 0.0 }
 0x2d9   :  { %1107 = vmatpush3.msra.mxu1 %v892_v57  ;;  %383 = vadd.xlane.f32.xlu1 %v382_v58 }
 0x2da   :  { %718 = vadd.xlane.f32.xlu0 %v717_v59  ;;  %1108 = vmatprep.mubr.msk.f32.mxu1 %vm1256_vm0, %v1255_v0 }
 0x2db   :  { %v1132_v60 = vpop.eup %1131 }
 0x2dc   :  { %1109 = vmatmul.mubr.msk.f32.vlgmr.msra.gmra.mxu1 %vm299_vm2, %v1132_v60  ;;  %v888_v61 = vsel %vm299_vm2, %v1132_v60, 0.0 }
 0x2de   :  { %889 = vadd.xlane.f32.xlu0 %v888_v61 }
 0x320   :  { %v454_v62 = vpop.f32.mrf.mxu1 }
 0x322   :  { %v1080_v63 = vpop.f32.mrf.mxu1 }
 0x35e   :  { %v547_v1 = vpop.xlane.xlu1 %546 }
 0x362   :  { %v384_v2 = vpop.xlane.xlu1 %383 }
 0x363   :  { %1133 = vrcp.f32 %v384_v2  ;;  %v719_v5 = vpop.xlane.xlu0 %718 }
 0x364   :  { %1135 = vrcp.f32 %v547_v1 }
 0x365   :  { %1137 = vrcp.f32 %v719_v5 }
 0x367   :  { %v890_v6 = vpop.xlane.xlu0 %889 }
 0x368   :  { %1139 = vrcp.f32 %v890_v6 }
 0x370   :  { %v1134_v3 = vpop.eup %1133 }
 0x371   :  { %v459_v4 = vmul.f32 %v1134_v3, %v454_v62  ;;  %v1136_v0 = vpop.eup %1135 }
 0x372   :  { %v1138_v10 = vpop.eup %1137 }
 0x373   :  { %460 = vst.msk [vmem:[#allocation10] sm:$0xff] %vm299_vm2, %v459_v4 }
 0x375   :  { %v1140_v14 = vpop.eup %1139 }
 0x394   :  { %v621_v7 = vpop.f32.mrf.mxu1 }
 0x395   :  { %v626_v8 = vmul.f32 %v1136_v0, %v621_v7 }
 0x396   :  { %v1090_v9 = vpop.f32.mrf.mxu1 }
 0x397   :  { %628 = vrot.lane.b32.xlu0 %v626_v8, %s1251_s19 }
 0x398   :  { %v792_v11 = vpop.f32.mrf.mxu1 }
 0x399   :  { %v797_v12 = vmul.f32 %v1138_v10, %v792_v11 }
 0x39a   :  { %v1100_v13 = vpop.f32.mrf.mxu1 }
 0x39b   :  { %799 = vrot.lane.b32.xlu1 %v797_v12, %s1260_s10 }
 0x39c   :  { %v963_v15 = vpop.f32.mrf.mxu1 }
 0x39d   :  { %v968_v16 = vmul.f32 %v1140_v14, %v963_v15 }
 0x39e   :  { %v1110_v17 = vpop.f32.mrf.mxu1 }
 0x39f   :  { %970 = vrot.lane.b32.xlu1 %v968_v16, %s1261_s11 }
 0x409   :  { %v629_v18 = vpop.permute.xlu0 %628 }
 0x40a   :  { %632 = vst.msk [vmem:[#allocation10] sm:$0xff] %vm631_vm3, %v629_v18 }
 0x40d   :  { %v800_v19 = vpop.permute.xlu1 %799 }
 0x40e   :  { %803 = vst.msk [vmem:[#allocation10] sm:$0xff] %vm802_vm4, %v800_v19 }
 0x411   :  { %v971_v20 = vpop.permute.xlu1 %970 }
 0x412   :  { %974 = vst.msk [vmem:[#allocation10] sm:$0xff] %vm973_vm5, %v971_v20 }
 0x413   :  { %1232 = shalt.err (!%p1229_p10)
}
 0x414   :  { %984 = dma.vmem_to_hbm [thread:$0]  %s982_s13, 128, %s1392_s4, [#allocation4]  }
 0x415   :  { %1247 = dma.done.wait [#allocation4], 128  }
 0x416   :  { %1248 = vsyncadd [#allocation4], 4294967168 }
 0x417   :  { %988 = vsyncpa [#allocation3], 1 }
 0x418   :  { %989 = vsyncpa [#allocation6], 1 }
 0x419   :  { %990 = vsyncpa [#allocation9], 1 }
 0x41a   :  { %991 = vsyncpa [#allocation4], 1 }

</bundles_post_ra>
